<compile_context>
chip_gen: v7x
topology: tpu7x:2x2x1
jax: 0.10.0
libtpu: 0.0.40
codegen_flags: <defaults>
</compile_context>

<pallas_src>
import jax
import jax.numpy as jnp
from jax.experimental import pallas as pl
from jax.experimental.pallas import tpu as pltpu


# ----------------------------- kernels ---------------------------------------------------------


def _kernel_fused(x_ref, halo_ref, w_ref, b_ref, o_ref, xw_ref):
    # Lane-aligned tile, fused form: one MXU matmul over the stacked shifted operand.
    #   x_ref   : (1, C_in, TL)    current L tile
    #   halo_ref: (1, 1, C_in, 2)  [..., 0] = column left of tile, [..., 1] = column right of tile
    #   w_ref   : (C_out, 3*C_in)  [W_left | W_center | W_right],  W_k = Wpw * wdw[:, k]
    #   b_ref   : (C_out, 1)       folded bias
    #   o_ref   : (1, C_out, TL)
    #   xw_ref  : (3*C_in, TL) VMEM scratch holding [x_{t-1}; x_t; x_{t+1}]
    xm = x_ref[0]
    c_in, tl = xm.shape
    halo = halo_ref[...]
    xw_ref[0:c_in, :] = pltpu.roll(xm, shift=1, axis=1)                  # x_{t-1}
    xw_ref[c_in:2 * c_in, :] = xm                                        # x_t
    xw_ref[2 * c_in:3 * c_in, :] = pltpu.roll(xm, shift=tl - 1, axis=1)  # x_{t+1}
    # Patch the two boundary columns from the halos (narrow stores, no full-tile selects).
    xw_ref[0:c_in, 0:1] = halo[0, 0, :, 0:1]
    xw_ref[2 * c_in:3 * c_in, tl - 1:tl] = halo[0, 0, :, 1:2]
    out = jnp.dot(w_ref[...], xw_ref[...], preferred_element_type=jnp.float32) + b_ref[...]
    o_ref[0] = out.astype(o_ref.dtype)


def _kernel_split(x_ref, halo_ref, w_ref, b_ref, o_ref, xl_ref, xr_ref):
    # Lane-aligned tile, large / non-8-multiple channel count: three MXU matmuls.
    #   w_ref : (3, C_out, C_in)
    xm = x_ref[0]
    c_in, tl = xm.shape
    halo = halo_ref[...]
    xl_ref[...] = pltpu.roll(xm, shift=1, axis=1)
    xl_ref[:, 0:1] = halo[0, 0, :, 0:1]
    xr_ref[...] = pltpu.roll(xm, shift=tl - 1, axis=1)
    xr_ref[:, tl - 1:tl] = halo[0, 0, :, 1:2]
    out = (jnp.dot(w_ref[0], xl_ref[...], preferred_element_type=jnp.float32)
           + jnp.dot(w_ref[1], xm, preferred_element_type=jnp.float32)
           + jnp.dot(w_ref[2], xr_ref[...], preferred_element_type=jnp.float32)
           + b_ref[...])
    o_ref[0] = out.astype(o_ref.dtype)


def _make_small_kernel(fuse):
    # Unaligned (single tile, L <= 128) fallback: build the shifted copies by value.
    def kernel(x_ref, halo_ref, w_ref, b_ref, o_ref):
        xm = x_ref[0]
        _, tl = xm.shape
        halo = halo_ref[...]
        hl = halo[0, 0, :, 0:1]
        hr = halo[0, 0, :, 1:2]
        if tl > 1:
            x_left = jnp.concatenate([hl, xm[:, :tl - 1]], axis=1)
            x_right = jnp.concatenate([xm[:, 1:], hr], axis=1)
        else:
            x_left, x_right = hl, hr
        if fuse:
            xw = jnp.concatenate([x_left, xm, x_right], axis=0)
            out = jnp.dot(w_ref[...], xw, preferred_element_type=jnp.float32) + b_ref[...]
        else:
            out = (jnp.dot(w_ref[0], x_left, preferred_element_type=jnp.float32)
                   + jnp.dot(w_ref[1], xm, preferred_element_type=jnp.float32)
                   + jnp.dot(w_ref[2], x_right, preferred_element_type=jnp.float32)
                   + b_ref[...])
        o_ref[0] = out.astype(o_ref.dtype)
    return kernel


# ----------------------------- wrapper ----------------------------------------------------------


def _choose_tiling(L, C_in, C_out, itemsize, vmem_budget):
    """Return (TL, Lp): lane-dense tile width and (possibly padded) sequence length."""
    if L <= 128:
        return L, L                         # single tile; block == full array dim
    Lp = -(-L // 128) * 128                 # pad ragged L up to a lane multiple
    for tl in (1024, 512, 256, 128):        # prefer the biggest lane-dense tile that fits
        if Lp % tl:
            continue
        need = (5 * C_in + 2 * C_out) * tl * itemsize   # x(x2) + out(x2) + shift scratch(x3)
        if need <= vmem_budget:
            return tl, Lp
    return 128, Lp


@jax.jit
def depthwise_separable_conv1d(x, w_dw, b_dw, w_pw, b_pw):
    """x: (N, C_in, L) -> (N, C_out, L). PyTorch NCL: depthwise Conv1d(k=3,pad=1) then 1x1 Conv1d."""
    N, C_in, L = x.shape
    C_out = w_pw.shape[0]
    f32 = jnp.float32

    # Fold depthwise into pointwise (exact, in f32):  W_k = Wpw * wdw[:, k],  b' = Wpw @ bdw + bpw.
    wdw = w_dw.reshape(C_in, 3).astype(f32)
    wpw = w_pw.reshape(C_out, C_in).astype(f32)
    w_stack = jnp.stack([wpw * wdw[None, :, k] for k in range(3)], axis=0)      # (3, C_out, C_in)
    b_fold = wpw @ b_dw.reshape(C_in, 1).astype(f32) + b_pw.reshape(C_out, 1).astype(f32)
    w_dtype = jnp.bfloat16 if x.dtype == jnp.bfloat16 else f32   # native bf16 MXU path for bf16 x
    w_stack = w_stack.astype(w_dtype)

    # Tiling / VMEM budget (generation-aware; v7x has 64 MiB, v5e/v6e 128 MiB).
    try:
        phys_vmem = int(pltpu.get_tpu_info().vmem_capacity_bytes)
    except Exception:
        phys_vmem = 64 * 1024 * 1024        # conservative (v7x) fallback
    itemsize = jnp.dtype(x.dtype).itemsize
    TL, Lp = _choose_tiling(L, C_in, C_out, itemsize, vmem_budget=int(0.4 * phys_vmem))
    LT = Lp // TL
    aligned = (TL % 128 == 0)
    # TODO(synk): on v5e the fused-K threshold should be 128 (4x128 MXU); 256 targets v6e/v7x.
    fuse = (C_in % 8 == 0) and (3 * C_in <= 256)

    # TODO(synk): replace the ragged-L pad with an in-kernel masked last tile to save a copy of x.
    xp = x if Lp == L else jnp.pad(x, ((0, 0), (0, 0), (0, Lp - L)))

    # Per-tile halo columns (tiny side input): left[l] = x[:, l*TL-1] (0 for l=0),
    # right[l] = x[:, (l+1)*TL] (0 for the last tile == Conv1d zero padding).
    zcol = jnp.zeros((N, C_in, 1), xp.dtype)
    left = jnp.concatenate([zcol, xp[:, :, TL - 1:Lp - 1:TL]], axis=2)           # (N, C_in, LT)
    right = jnp.concatenate([xp[:, :, TL::TL], zcol], axis=2)                    # (N, C_in, LT)
    halos = jnp.transpose(jnp.stack([left, right], axis=-1), (0, 2, 1, 3))       # (N, LT, C_in, 2)

    # Kernel / weight-layout variant.
    # TODO(synk): for very large C_in*C_out, tile C_out ("parallel") / C_in ("arbitrary") grid axes
    # instead of keeping the full folded weight VMEM-resident, and single-buffer it (pl.Buffered(1)).
    if fuse:
        w_arg = jnp.concatenate([w_stack[0], w_stack[1], w_stack[2]], axis=1)    # (C_out, 3*C_in)
        w_spec = pl.BlockSpec((C_out, 3 * C_in), lambda n, l: (0, 0))
    else:
        w_arg = w_stack                                                          # (3, C_out, C_in)
        w_spec = pl.BlockSpec((3, C_out, C_in), lambda n, l: (0, 0, 0))
    if aligned and fuse:
        kernel = _kernel_fused
        scratch = [pltpu.VMEM((3 * C_in, TL), xp.dtype)]
    elif aligned:
        kernel = _kernel_split
        scratch = [pltpu.VMEM((C_in, TL), xp.dtype), pltpu.VMEM((C_in, TL), xp.dtype)]
    else:
        kernel = _make_small_kernel(fuse)
        scratch = []

    wsize = jnp.dtype(w_dtype).itemsize
    vmem_need = (2 * C_in * TL * itemsize            # x block, double-buffered
                 + 2 * C_out * TL * itemsize         # out block, double-buffered
                 + 2 * C_in * 2 * itemsize           # halo block, double-buffered
                 + 2 * 3 * C_out * C_in * wsize      # folded weights, double-buffered
                 + 2 * C_out * 4                     # folded bias
                 + 3 * C_in * TL * itemsize)         # shift scratch (upper bound)
    vmem_limit = int(min(max(2 * vmem_need, 32 * 1024 * 1024), int(0.85 * phys_vmem)))

    out = pl.pallas_call(
        kernel,
        out_shape=jax.ShapeDtypeStruct((N, C_out, Lp), x.dtype),
        grid_spec=pltpu.PrefetchScalarGridSpec(
            num_scalar_prefetch=0,
            grid=(N, LT),
            in_specs=[
                pl.BlockSpec((1, C_in, TL), lambda n, l: (n, 0, l)),
                pl.BlockSpec((1, 1, C_in, 2), lambda n, l: (n, l, 0, 0)),
                w_spec,
                pl.BlockSpec((C_out, 1), lambda n, l: (0, 0)),
            ],
            out_specs=pl.BlockSpec((1, C_out, TL), lambda n, l: (n, 0, l)),
            scratch_shapes=scratch,
        ),
        compiler_params=pltpu.CompilerParams(
            dimension_semantics=("parallel", "parallel"),   # no cross-tile carry -> fully parallel
            vmem_limit_bytes=vmem_limit,
        ),
    )(xp, halos, w_arg, b_fold)
    return out if Lp == L else out[:, :, :L]


# ----------------------------- reference & tests ------------------------------------------------


def _reference(x, w_dw, b_dw, w_pw, b_pw):
    # Pure-JAX reference mirroring PyTorch Conv1d semantics (depthwise k=3 pad=1, then 1x1).
    N, C_in, L = x.shape
    C_out = w_pw.shape[0]
    x_pad = jnp.pad(x, ((0, 0), (0, 0), (1, 1)))
    wdw = w_dw.reshape(C_in, 3)
    y = (wdw[None, :, 0:1] * x_pad[:, :, 0:L]
         + wdw[None, :, 1:2] * x_pad[:, :, 1:L + 1]
         + wdw[None, :, 2:3] * x_pad[:, :, 2:L + 2]
         + b_dw.reshape(1, C_in, 1))
    out = jnp.einsum("oc,ncl->nol", w_pw.reshape(C_out, C_in), y) + b_pw.reshape(1, C_out, 1)
    return out


if __name__ == "__main__":
    key = jax.random.PRNGKey(0)

    def run_case(k, N, C_in, C_out, L):
        k1, k2, k3, k4, k5 = jax.random.split(k, 5)
        x = jax.random.normal(k1, (N, C_in, L), dtype=jnp.float32)
        w_dw = jax.random.normal(k2, (C_in, 1, 3), dtype=jnp.float32) * 0.5
        b_dw = jax.random.normal(k3, (C_in,), dtype=jnp.float32) * 0.1
        w_pw = jax.random.normal(k4, (C_out, C_in, 1), dtype=jnp.float32) * 0.5
        b_pw = jax.random.normal(k5, (C_out,), dtype=jnp.float32) * 0.1

        out = jax.block_until_ready(depthwise_separable_conv1d(x, w_dw, b_dw, w_pw, b_pw))
        ref = _reference(x, w_dw, b_dw, w_pw, b_pw)
        assert out.shape == (N, C_out, L), (out.shape, (N, C_out, L))
        err = float(jnp.max(jnp.abs(out - ref)))
        assert jnp.allclose(out, ref, atol=1e-4, rtol=1e-4), f"max abs err {err}"

    keys = jax.random.split(key, 3)
    # Small module-spec shape: single unaligned tile, 3-dot path (C_in % 8 != 0).
    run_case(keys[0], N=2, C_in=4, C_out=8, L=16)
    # Multi-tile lane-aligned path with the fused single-matmul form (TL=128, 5 tiles, 3*C_in=24).
    run_case(keys[1], N=2, C_in=8, C_out=16, L=640)
    # Ragged L (padded 200 -> 256) exercising the aligned 3-dot path (C_in % 8 != 0).
    run_case(keys[2], N=1, C_in=12, C_out=8, L=200)

    print("KERNEL_OK")
</pallas_src>

<mosaic_0001>
module attributes {stable_mosaic.version = 11 : i64} {
  func.func @kernel(%arg0: i32, %arg1: i32, %arg2: memref<1x4x16xf32, #tpu.memory_space<vmem>>, %arg3: memref<1x1x4x2xf32, #tpu.memory_space<vmem>>, %arg4: memref<3x8x4xf32, #tpu.memory_space<vmem>>, %arg5: memref<8x1xf32, #tpu.memory_space<vmem>>, %arg6: memref<1x8x16xf32, #tpu.memory_space<vmem>>) attributes {dimension_semantics = [#tpu.dimension_semantics<parallel>, #tpu.dimension_semantics<parallel>], iteration_bounds = array<i64: 2, 1>, scalar_prefetch = 0 : i64, scratch_operands = 0 : i64, tpu.core_type = #tpu.core_type<tc>, window_params = [{transform_indices = @transform_0, window_bounds = array<i64: 1, 4, 16>}, {transform_indices = @transform_1, window_bounds = array<i64: 1, 1, 4, 2>}, {pipeline_mode = #tpu.pipeline_mode<synchronous>, transform_indices = @transform_2, window_bounds = array<i64: 3, 8, 4>}, {pipeline_mode = #tpu.pipeline_mode<synchronous>, transform_indices = @transform_3, window_bounds = array<i64: 8, 1>}, {transform_indices = @transform_4, window_bounds = array<i64: 1, 8, 16>}]} {
    %c0 = arith.constant 0 : index
    %c0_0 = arith.constant 0 : index
    %c0_1 = arith.constant 0 : index
    %0 = vector.load %arg2[%c0, %c0_0, %c0_1] : memref<1x4x16xf32, #tpu.memory_space<vmem>>, vector<1x4x16xf32>
    %1 = vector.shape_cast %0 : vector<1x4x16xf32> to vector<4x16xf32>
    %c0_2 = arith.constant 0 : index
    %c0_3 = arith.constant 0 : index
    %c0_4 = arith.constant 0 : index
    %c0_5 = arith.constant 0 : index
    %2 = vector.load %arg3[%c0_2, %c0_3, %c0_4, %c0_5] : memref<1x1x4x2xf32, #tpu.memory_space<vmem>>, vector<1x1x4x2xf32>
    %3 = vector.extract_strided_slice %2 {offsets = [0, 0, 0, 0], sizes = [1, 1, 4, 1], strides = [1, 1, 1, 1]} : vector<1x1x4x2xf32> to vector<1x1x4x1xf32>
    %4 = vector.shape_cast %3 : vector<1x1x4x1xf32> to vector<4x1xf32>
    %5 = vector.extract_strided_slice %2 {offsets = [0, 0, 0, 1], sizes = [1, 1, 4, 1], strides = [1, 1, 1, 1]} : vector<1x1x4x2xf32> to vector<1x1x4x1xf32>
    %6 = vector.shape_cast %5 : vector<1x1x4x1xf32> to vector<4x1xf32>
    %7 = vector.extract_strided_slice %1 {offsets = [0, 0], sizes = [4, 15], strides = [1, 1]} : vector<4x16xf32> to vector<4x15xf32>
    %8 = tpu.concatenate %4, %7 in 1 : vector<4x1xf32>, vector<4x15xf32> -> vector<4x16xf32>
    %9 = vector.extract_strided_slice %1 {offsets = [0, 1], sizes = [4, 15], strides = [1, 1]} : vector<4x16xf32> to vector<4x15xf32>
    %10 = tpu.concatenate %9, %6 in 1 : vector<4x15xf32>, vector<4x1xf32> -> vector<4x16xf32>
    %c0_6 = arith.constant 0 : index
    %c0_7 = arith.constant 0 : index
    %c0_8 = arith.constant 0 : index
    %11 = vector.load %arg4[%c0_6, %c0_7, %c0_8] : memref<3x8x4xf32, #tpu.memory_space<vmem>>, vector<1x8x4xf32>
    %12 = vector.shape_cast %11 : vector<1x8x4xf32> to vector<8x4xf32>
    %cst = arith.constant dense<0.000000e+00> : vector<8x16xf32>
    %13 = tpu.matmul %12, %8, %cst {dimension_numbers = #tpu.dot_dimension_numbers<[1], [0], [0], [1], [0, 0, 1, 1], [], []>} : vector<8x4xf32>, vector<4x16xf32>, vector<8x16xf32> -> vector<8x16xf32>
    %c1 = arith.constant 1 : index
    %c0_9 = arith.constant 0 : index
    %c0_10 = arith.constant 0 : index
    %14 = vector.load %arg4[%c1, %c0_9, %c0_10] : memref<3x8x4xf32, #tpu.memory_space<vmem>>, vector<1x8x4xf32>
    %15 = vector.shape_cast %14 : vector<1x8x4xf32> to vector<8x4xf32>
    %cst_11 = arith.constant dense<0.000000e+00> : vector<8x16xf32>
    %16 = tpu.matmul %15, %1, %cst_11 {dimension_numbers = #tpu.dot_dimension_numbers<[1], [0], [0], [1], [0, 0, 1, 1], [], []>} : vector<8x4xf32>, vector<4x16xf32>, vector<8x16xf32> -> vector<8x16xf32>
    %17 = arith.addf %13, %16 : vector<8x16xf32>
    %c2 = arith.constant 2 : index
    %c0_12 = arith.constant 0 : index
    %c0_13 = arith.constant 0 : index
    %18 = vector.load %arg4[%c2, %c0_12, %c0_13] : memref<3x8x4xf32, #tpu.memory_space<vmem>>, vector<1x8x4xf32>
    %19 = vector.shape_cast %18 : vector<1x8x4xf32> to vector<8x4xf32>
    %cst_14 = arith.constant dense<0.000000e+00> : vector<8x16xf32>
    %20 = tpu.matmul %19, %10, %cst_14 {dimension_numbers = #tpu.dot_dimension_numbers<[1], [0], [0], [1], [0, 0, 1, 1], [], []>} : vector<8x4xf32>, vector<4x16xf32>, vector<8x16xf32> -> vector<8x16xf32>
    %21 = arith.addf %17, %20 : vector<8x16xf32>
    %c0_15 = arith.constant 0 : index
    %c0_16 = arith.constant 0 : index
    %22 = vector.load %arg5[%c0_15, %c0_16] : memref<8x1xf32, #tpu.memory_space<vmem>>, vector<8x1xf32>
    %23 = vector.broadcast %22 : vector<8x1xf32> to vector<8x16xf32>
    %24 = arith.addf %21, %23 : vector<8x16xf32>
    %c0_17 = arith.constant 0 : index
    %c0_18 = arith.constant 0 : index
    %c0_19 = arith.constant 0 : index
    %25 = vector.load %arg6[%c0_17, %c0_18, %c0_19] : memref<1x8x16xf32, #tpu.memory_space<vmem>>, vector<1x8x16xf32>
    %26 = vector.shape_cast %25 : vector<1x8x16xf32> to vector<8x16xf32>
    %27 = vector.shape_cast %24 : vector<8x16xf32> to vector<1x8x16xf32>
    tpu.vector_store %arg6[%c0_17, %c0_18, %c0_19], %27 {strides = array<i32>} : memref<1x8x16xf32, #tpu.memory_space<vmem>>, vector<1x8x16xf32>,
    return
  }
  func.func @transform_0(%arg0: i32, %arg1: i32) -> (i32, i32, i32) {
    %c0_i32 = arith.constant 0 : i32
    %c0_i32_0 = arith.constant 0 : i32
    return %arg0, %c0_i32, %arg1 : i32, i32, i32
  }
  func.func @transform_1(%arg0: i32, %arg1: i32) -> (i32, i32, i32, i32) {
    %c0_i32 = arith.constant 0 : i32
    %c0_i32_0 = arith.constant 0 : i32
    %c0_i32_1 = arith.constant 0 : i32
    return %arg0, %arg1, %c0_i32, %c0_i32_0 : i32, i32, i32, i32
  }
  func.func @transform_2(%arg0: i32, %arg1: i32) -> (i32, i32, i32) {
    %c0_i32 = arith.constant 0 : i32
    %c0_i32_0 = arith.constant 0 : i32
    %c0_i32_1 = arith.constant 0 : i32
    %c0_i32_2 = arith.constant 0 : i32
    return %c0_i32, %c0_i32_0, %c0_i32_1 : i32, i32, i32
  }
  func.func @transform_3(%arg0: i32, %arg1: i32) -> (i32, i32) {
    %c0_i32 = arith.constant 0 : i32
    %c0_i32_0 = arith.constant 0 : i32
    %c0_i32_1 = arith.constant 0 : i32
    return %c0_i32, %c0_i32_0 : i32, i32
  }
  func.func @transform_4(%arg0: i32, %arg1: i32) -> (i32, i32, i32) {
    %c0_i32 = arith.constant 0 : i32
    %c0_i32_0 = arith.constant 0 : i32
    return %arg0, %c0_i32, %arg1 : i32, i32, i32
  }
}

</mosaic_0001>

<bundles_post_ra>
// kernel: depthwise_separable_conv1d.1
= control target key start
LH: loop header
LB: loop body
LE: loop exit
PB: predicated region body
PF: predicated region fallthrough
CT: control target
= control target key end

     0   :  { %9 = vsyncpa [#allocation3], 0  ;;  %s960_s0 = inlined_call_operand.vmem [shape: f32[2,4,16], index: 0, kind: input, shape index: {}]   ;;  %s961_s1 = inlined_call_operand.vmem [shape: f32[2,1,4,2], index: 1, kind: input, shape index: {}]   ;;  %s962_s2 = inlined_call_operand.vmem [shape: f32[3,8,4], index: 2, kind: input, shape index: {}]   ;;  %s963_s3 = inlined_call_operand.vmem [shape: f32[8,1], index: 3, kind: input, shape index: {}]   ;;  %s964_s4 = inlined_call_operand.hbm [shape: f32[2,8,16], index: 4, kind: output, shape index: {}]  }
   0x1   :  { %11 = vsyncpa [#allocation3 + $0x1], 0  ;;  %s824_s15 = smov 0   ;;  %s826_s16 = smov 0  }
   0x2   :  { %s828_s17 = smov 0   ;;  %s830_s18 = smov 0  }
   0x3   :  { %s832_s19 = smov 0   ;;  %s834_s20 = smov 0  }
   0x4 LB: > { %s608_s21 = sadd.s32 4294967295, %s790_s20   ;;  %s609_s22 = sadd.s32 4294967294, %s790_s20   ;;  %s790_s20 = sphi %s834_s20, %s17_s20   ;;  %s786_s19 = sphi %s832_s19, %s971_s19   ;;  %s782_s18 = sphi %s830_s18, %s970_s18   ;;  %s778_s17 = sphi %s828_s17, %s969_s17   ;;  %s774_s16 = sphi %s826_s16, %s968_s16   ;;  %s770_s15 = sphi %s824_s15, %s967_s15  }
   0x5   : > { %s29_s23 = sadd.s32 1, %s786_s19  ;;  %s136_s24 = sadd.s32 1, %s778_s17 }
   0x6   : > { %p31_p0 = scmp.ge.s32.totalorder %s29_s23, 2  ;;  %p146_p1 = scmp.ne.s32.totalorder %s778_s17, %s774_s16 }
   0x7   : > { %p147_p2 = scmp.eq.s32.totalorder %s608_s21, 1  ;;  %p152_p3 = scmp.ne.s32.totalorder %s774_s16, %s770_s15 }
   0x8   : > { %s973_s23 = smov (%p31_p0, %s29_s23), 0  ;;  %p153_p5 = scmp.eq.s32.totalorder %s609_s22, 1 }
   0x9   : > { %p864_p4 = por %p147_p2, %p146_p1  ;;  %s131_s26 = ssub.s32 %s786_s19, %s973_s23 }
   0xa   : > { %p612_p6 = scmp.ge.s32.totalorder %s790_s20, 1  ;;  %p134_p7 = scmp.eq.s32.totalorder %s131_s26, 0 }
   0xb   : > { %p871_p8 = por %p153_p5, %p152_p3  ;;  %p197_p9 = scmp.lt.s32.totalorder %s790_s20, 3 }
   0xc   : > { %s877_s28 = scalar_select %p134_p7, %s778_s17, %s136_s24  }
   0xd   : > { %p198_p10 = pnand %p612_p6, %p197_p9 }
   0xe   : > { %p232_p11 = scmp.lt.s32.totalorder (!%p198_p10), %s782_s18, 1  ;;  %v792_v0 = vmov (!%p198_p10), 0.0   ;;  %vm793_vm0 = vmmov (!%p198_p10), 0   ;;  %v794_v1 = vmov (!%p198_p10), 0   ;;  %vm270_vm1 = vcmask (!%p198_p10), 1043456   ;;  %v616_v4 = vld [vmem:[%s962_s2 + $0x8] sm:$0xff] (!%p198_p10) }
   0xf   : > { %201 = sbr.rel (%p198_p10) target bundleno = 378 (0x17a), region = 36  ;;  %639 = vmatprep.subr.mxu1 (!%p198_p10), %v792_v0  ;;  %634 = vmatprep.subr.mxu0 (!%p198_p10), %v792_v0  ;;  %vm266_vm2 = vcmask (!%p198_p10), 31744   ;;  %s795_s13 = smov (!%p198_p10), 1   ;;  %v498_v5 = vld [vmem:[%s963_s3] sm:$0xff] (!%p198_p10)  ;;  %vm252_vm3 = vcmask (!%p198_p10), 7168   ;;  %vm261_vm4 = vcmask (!%p198_p10), 121856  }
  0x10   : > { %636 = vmatprep.mubr.msk.f32.mxu0 (!%p198_p10), %vm793_vm0, %v792_v0  ;;  %641 = vmatprep.mubr.msk.f32.mxu1 (!%p198_p10), %vm793_vm0, %v792_v0  ;;  %s796_s14 = smov (!%p198_p10), 14   ;;  %s797_s24 = smov (!%p198_p10), 127   ;;  %v263_v7 = vld [vmem:[%s962_s2] sm:$0xff] (!%p198_p10)  ;;  %v621_v11 = vld [vmem:[%s962_s2 + $0x10] sm:$0xff] (!%p198_p10)  ;;  %vm505_vm5 = vcmask (!%p198_p10), 130048  }
  0x11   : > { %710 = vset.pattern.permute.xlu1 (!%p198_p10), %v794_v1  ;;  %711 = vset.pattern.permute.xlu0 (!%p198_p10), %v794_v1  ;;  %s229_s6 = sand.u32 (!%p198_p10), 1, %s774_s16   ;;  %s625_s8 = sshll.u32 (!%p198_p10), %s782_s18, 7 }
  0x16   : > { %s233_s29 = scalar_select %p232_p11, %s782_s18, 1 }
  0x17   : > { %s798_s18 = smov [#allocation2]  }
  0x18   : > { %s614_s30 = sshll.u32 %s233_s29, 2  ;;  %s716_s22 = sshll.u32 %s798_s18, 4  ;;  %s717_s22 = int_to_ptr.vmem [resolvable:$false] %s716_s22 }
  0x19   : > { %s238_s7 = scalar_lea.vmem %s960_s0, %s614_s30  ;;  %s245_s10 = scalar_lea.vmem %s961_s1, %s614_s30 }
  0x1a   : > { %v246_v2 = vld [vmem:[%s238_s7] sm:$0xf]  ;;  %s613_s7 = sshll.u32 %s229_s6, 3 }
  0x1b   : > { %v247_v3 = vld [vmem:[%s245_s10] sm:$0xf]  ;;  %249 = vrot.lane.b32.xlu0 %v246_v2, %s795_s13  ;;  %635 = vmatpush3.msk.msra.mxu0 %vm270_vm1, %v246_v2  ;;  %s231_s9 = scalar_lea.vmem [#allocation2], %s613_s7  ;;  %s913_s13 = scalar_lea.hbm %s964_s4, %s625_s8 }
  0x1c   : > { %258 = vrot.lane.b32.xlu1 %v247_v3, %s796_s14  ;;  %637 = vmatmul.mubr.msk.f32.vlgmr.msra.gmra.mrb[0].mxu0 %vm266_vm2, %v616_v4  ;;  %s522_s10 = sshll.u32 %s231_s9, 4  ;;  %s508_s14 = scalar_lea.sflag [#allocation3], %s229_s6  ;;  %s915_s10 = int_to_ptr.vmem [resolvable:$true] %s522_s10 }
  0x1d   : > { %644 = vmatprep.subr.mxu0 %v792_v0  ;;  %646 = vmatprep.mubr.msk.f32.mxu0 %vm793_vm0, %v792_v0  ;;  %s712_s21 = scalar_lea.vmem %s915_s10, 128  ;;  %p719_p1 = scmp.lt.s32.totalorder %s915_s10, %s717_s22 }
  0x1e   : > { %p713_p12 = scmp.ne.s32.totalorder %s915_s10, %s712_s21 }
  0x1f   : > { %254 = vrot.lane.b32.xlu0 %v246_v2, %s797_s24  ;;  %s718_s24 = scalar_lea.vmem %s717_s22, 256 }
  0x20   : > { %501 = vperm.xlu1 %710, %v498_v5   ;;  %p714_p13 = pnand %p713_p12, %p864_p4  ;;  %p720_p2 = scmp.lt.s32.totalorder %s718_s24, %s712_s21 }
  0x22   : > { %p715_p0 = pneg %p714_p13  ;;  %p721_p3 = por %p720_p2, %p719_p1 }
  0x24   : > { %p722_p5 = pnand %p721_p3, %p715_p0 }
  0x8d   : > { %v250_v6 = vpop.permute.xlu0 %249 }
  0x8e   : > { %v253_v8 = vsel %vm252_vm3, %v247_v3, %v250_v6  ;;  %v259_v9 = vpop.permute.xlu1 %258 }
  0x8f   : > { %640 = vmatpush3.msk.msra.mxu1 %vm270_vm1, %v253_v8 }
  0x90   : > { %642 = vmatmul.mubr.msk.f32.vlgmr.msra.gmra.mrb[0].mxu1 %vm266_vm2, %v263_v7 }
  0x91   : > { %v255_v10 = vpop.permute.xlu0 %254 }
  0x92   : > { %v262_v12 = vsel %vm261_vm4, %v255_v10, %v259_v9 }
  0x93   : > { %645 = vmatpush3.msk.msra.mxu0 %vm270_vm1, %v262_v12 }
  0x94   : > { %647 = vmatmul.mubr.msk.f32.vlgmr.msra.gmra.mrb[2].mxu0 %vm266_vm2, %v621_v11 }
  0x9f   : > { %v502_v19 = vpop.permute.xlu1 %501 }
  0xef   : > { %v339_v13 = vpop.f32.mrb[0].mxu0 }
  0xf0   : > { %v638_v14 = vpop.f32.mrb[1].mxu0 }
 0x163   : > { %v415_v15 = vpop.f32.mrb[0].mxu1 }
 0x164   : > { %v416_v16 = vadd.f32 %v415_v15, %v339_v13  ;;  %v643_v17 = vpop.f32.mrb[1].mxu1 }
 0x167   : > { %v493_v18 = vpop.f32.mrb[2].mxu0 }
 0x168   : > { %v497_v20 = vadd.f32 %v493_v18, %v416_v16  ;;  %v648_v21 = vpop.f32.mrb[3].mxu0 }
 0x16a   : > { %v504_v22 = vadd.f32 %v502_v19, %v497_v20 }
 0x16c   : > { %506 = vst.msk [vmem:[%s231_s9] sm:$0xff] %vm505_vm5, %v504_v22 }
 0x16d   : > { %725 = shalt.err (!%p722_p5)
}
 0x16e   : > { %s726_s26 = scalar_lea.hbm %s913_s13, 128  ;;  %s730_s5 = scalar_lea.hbm %s964_s4, 256 }
 0x16f   : > { %p727_p6 = scmp.ne.s32.totalorder %s913_s13, %s726_s26  ;;  %p731_p10 = scmp.lt.u32.totalorder %s913_s13, %s964_s4 }
 0x170   : > { %p732_p11 = scmp.lt.u32.totalorder %s730_s5, %s726_s26  ;;  %p734_p13 = scmp.lt.u32.totalorder %s726_s26, %s913_s13 }
 0x171   : > { %p728_p7 = pnand %p727_p6, %p864_p4 }
 0x172   : > { %p733_p12 = por %p732_p11, %p731_p10 }
 0x173   : > { %p729_p9 = pneg %p728_p7 }
 0x174   : > { %p735_p0 = por %p734_p13, %p733_p12 }
 0x176   : > { %p736_p1 = pnand %p735_p0, %p729_p9 }
 0x178   : > { %739 = shalt.err (!%p736_p1)
}
 0x179   : > { %649 = dma.vmem_to_hbm [thread:$0]  (%p864_p4), %s915_s10, 128, %s913_s13, %s508_s14  }
 0x17a PF: > { %p655_p2 = scmp.ge.s32.totalorder %s790_s20, 2  ;;  %s534_s8 = sand.u32 1, %s770_s15  }
 0x17b   : > { %s535_s9 = scalar_lea.sflag [#allocation3], %s534_s8 }
 0x17c   : > { %p652_p3 = pnand %p655_p2, %p871_p8 }
 0x17e   : > { %765 = dma.done.wait (!%p652_p3), %s535_s9, 128  }
 0x17f   : > { %767 = vsyncadd (!%p652_p3), %s535_s9, 4294967168  ;;  %s17_s20 = sadd.s32 1, %s790_s20   ;;  %s967_s15 = smov %s774_s16 }
 0x180   : > { %p14_p5 = scmp.ge.s32.totalorder %s17_s20, 4   ;;  %s968_s16 = smov %s778_s17 }
 0x181   : > { %s969_s17 = smov %s877_s28  ;;  %s970_s18 = smov %s786_s19 }
 0x182   : > { %s971_s19 = smov %s973_s23  ;;  %16 = sbr.rel (!%p14_p5) target bundleno = 4 (0x4), region = 76 }
 0x189   :  { %540 = vsyncpa [#allocation3], 1 }
 0x18a   :  { %542 = vsyncpa [#allocation3 + $0x1], 1 }

</bundles_post_ra>
